<compile_context>
chip_gen: v6e
topology: v6e:2x2x1
jax: 0.10.0
libtpu: 0.0.40
codegen_flags: <defaults>
</compile_context>

<pallas_src>
import jax
import jax.numpy as jnp
from jax import lax
from jax.experimental import pallas as pl
from jax.experimental.pallas import tpu as pltpu


def make_rdb_kernel(G0, G, C, H, W, compute_dtype=jnp.float32):
    """compute_dtype: matmul-input dtype (bf16 on v6e/v7x for ~2x MXU rate);
    elementwise math and accumulation stay f32."""
    P = H * W
    Ctot = G0 + C * G
    offs = [(dy, dx) for dy in (-1, 0, 1) for dx in (-1, 0, 1)]  # s = (dy+1)*3+(dx+1)

    def kernel(*args):
        x_ref = args[0]                       # (1, G0, P)   input block
        mask_ref = args[1]                    # (9, 1, P)    f32 boundary masks
        w_refs = args[2:2 + C]                # each (9*G, Cin_i) compute_dtype
        b_ref = args[2 + C]                   # (C, G, 1)    f32
        wb_ref = args[3 + C]                  # (G0, Ctot)   compute_dtype
        bb_ref = args[4 + C]                  # (G0, 1)      f32
        o_ref = args[5 + C]                   # (1, G0, P)   output block
        feat = args[6 + C]                    # (Ctot, P)    VMEM scratch (dense concat)

        xv = x_ref[0]                                       # (G0, P)
        x_f32 = xv.astype(jnp.float32)
        feat[pl.ds(0, G0), :] = xv.astype(compute_dtype)    # chunk 0 of the concat

        masks = mask_ref[...]                               # (9, 1, P) f32
        bv = b_ref[...]                                     # (C, G, 1) f32

        for i in range(C):
            cin = G0 + i * G
            wv = w_refs[i][...]                             # (9G, cin) compute_dtype
            # One big matmul per layer: all 9 taps stacked along M.
            y = jnp.dot(wv, feat[pl.ds(0, cin), :],
                        preferred_element_type=jnp.float32)  # (9G, P) f32
            # roll+mask commute with left-mult: W_s@(roll(F)*m) == roll(W_s@F)*m.
            acc = y[4 * G:5 * G, :]                          # center tap: no roll/mask
            for s, (dy, dx) in enumerate(offs):
                if dy == 0 and dx == 0:
                    continue
                d = dy * W + dx
                slab = y[s * G:(s + 1) * G, :]
                acc = acc + pltpu.roll(slab, shift=(-d) % P, axis=1) * masks[s]
            out_f32 = jnp.maximum(acc + bv[i], 0.0)          # bias + ReLU in f32
            feat[pl.ds(G0 + i * G, G), :] = out_f32.astype(compute_dtype)

        # 1x1 bottleneck straight off the scratch concat + residual add.
        bott = jnp.dot(wb_ref[...], feat[...],
                       preferred_element_type=jnp.float32)   # (G0, P)
        bott = bott + bb_ref[...]
        o_ref[0] = (bott + x_f32).astype(o_ref.dtype)

    return kernel


def rdb_forward(x_nchw, conv_ws, conv_bs, wb, bb, *, compute_dtype=jnp.float32):
    """x_nchw: (N, G0, H, W); conv_ws[i]: (G, G0+i*G, 3, 3) OIHW;
    conv_bs[i]: (G,); wb: (G0, Ctot, 1, 1); bb: (G0,)."""
    N, G0, H, W = x_nchw.shape
    C = len(conv_ws)
    G = conv_ws[0].shape[0]
    Ctot = G0 + C * G
    P = H * W

    # Pure reshape: NCHW row-major -> (N, C, H*W); no transpose, no copy.
    x2 = x_nchw.reshape(N, G0, P)

    # Conv weights OIHW (G, Cin, 3, 3) -> (3,3,G,Cin) -> (9*G, Cin):
    # row s*G+g is tap s = ky*3+kx, output channel g.  Pre-cast to compute_dtype.
    ws = [jnp.transpose(w, (2, 3, 0, 1)).reshape(9 * G, w.shape[1])
          .astype(compute_dtype) for w in conv_ws]
    b_all = jnp.stack([b.reshape(G, 1) for b in conv_bs],
                      axis=0).astype(jnp.float32)                 # (C, G, 1)
    wb2 = wb[:, :, 0, 0].astype(compute_dtype)                    # (G0, Ctot)
    bb2 = bb.reshape(G0, 1).astype(jnp.float32)                   # (G0, 1)

    # Host-side 0/1 boundary masks over the flattened spatial axis.
    offs = [(dy, dx) for dy in (-1, 0, 1) for dx in (-1, 0, 1)]
    pids = jnp.arange(P)
    yy, xx = pids // W, pids % W
    mask_arr = jnp.stack(
        [((yy + dy >= 0) & (yy + dy < H) & (xx + dx >= 0) & (xx + dx < W))
         .astype(jnp.float32) for dy, dx in offs],
        axis=0).reshape(9, 1, P)                                  # (9, 1, P)

    in_specs = [pl.BlockSpec((1, G0, P), lambda n: (n, 0, 0)),    # x
                pl.BlockSpec((9, 1, P), lambda n: (0, 0, 0))]     # masks
    for w in ws:
        in_specs.append(pl.BlockSpec(w.shape, lambda n: (0, 0)))
    in_specs.append(pl.BlockSpec(b_all.shape, lambda n: (0, 0, 0)))
    in_specs.append(pl.BlockSpec(wb2.shape, lambda n: (0, 0)))
    in_specs.append(pl.BlockSpec(bb2.shape, lambda n: (0, 0)))
    out_spec = pl.BlockSpec((1, G0, P), lambda n: (n, 0, 0))

    # Scheduling hint for XLA.
    flops = N * (sum(2 * 9 * G * (G0 + i * G) * P for i in range(C))
                 + 2 * G0 * Ctot * P)
    bytes_accessed = (2 * N * G0 * P) * x2.dtype.itemsize \
        + sum(int(w.size) * w.dtype.itemsize for w in ws) \
        + int(b_all.size) * 4 + int(wb2.size) * wb2.dtype.itemsize \
        + int(bb2.size) * 4 + int(mask_arr.size) * 4

    kernel = make_rdb_kernel(G0, G, C, H, W, compute_dtype=compute_dtype)
    out = pl.pallas_call(
        kernel,
        out_shape=jax.ShapeDtypeStruct((N, G0, P), x_nchw.dtype),
        grid_spec=pltpu.PrefetchScalarGridSpec(
            num_scalar_prefetch=0,
            grid=(N,),
            in_specs=in_specs,
            out_specs=out_spec,
            scratch_shapes=[pltpu.VMEM((Ctot, P), compute_dtype)],
        ),
        compiler_params=pltpu.CompilerParams(dimension_semantics=("parallel",)),
        cost_estimate=pl.CostEstimate(flops=flops, transcendentals=0,
                                      bytes_accessed=bytes_accessed),
    )(x2, mask_arr, *ws, b_all, wb2, bb2)

    return out.reshape(N, G0, H, W)


def rdb_reference(x_nchw, conv_ws, conv_bs, wb, bb):
    """Pure-JAX reference mirroring the PyTorch forward (NHWC internally)."""
    x = jnp.transpose(x_nchw, (0, 2, 3, 1))
    feats = x
    for w, b in zip(conv_ws, conv_bs):
        w_hwio = jnp.transpose(w, (2, 3, 1, 0))
        y = lax.conv_general_dilated(feats, w_hwio, (1, 1), "SAME",
                                     dimension_numbers=("NHWC", "HWIO", "NHWC"))
        y = jnp.maximum(y + b.reshape(1, 1, 1, -1), 0.0)
        feats = jnp.concatenate([feats, y], axis=-1)
    wb_hwio = jnp.transpose(wb, (2, 3, 1, 0))
    out = lax.conv_general_dilated(feats, wb_hwio, (1, 1), "SAME",
                                   dimension_numbers=("NHWC", "HWIO", "NHWC"))
    out = out + bb.reshape(1, 1, 1, -1) + x
    return jnp.transpose(out, (0, 3, 1, 2))


if __name__ == "__main__":
    # Small, deterministic config: G0=8, G=8, C=3, batch=2, 16x16 spatial.
    N, G0, G, C, H, W = 2, 8, 8, 3, 16, 16
    Ctot = G0 + C * G

    key = jax.random.PRNGKey(0)
    keys = jax.random.split(key, 2 * C + 3)

    conv_ws, conv_bs = [], []
    for i in range(C):
        cin = G0 + i * G
        fan_in = cin * 9
        conv_ws.append(jax.random.normal(keys[2 * i], (G, cin, 3, 3),
                                         jnp.float32) * (1.0 / fan_in) ** 0.5)
        conv_bs.append(jax.random.normal(keys[2 * i + 1], (G,), jnp.float32) * 0.01)
    wb = jax.random.normal(keys[2 * C], (G0, Ctot, 1, 1),
                           jnp.float32) * (1.0 / Ctot) ** 0.5
    bb = jax.random.normal(keys[2 * C + 1], (G0,), jnp.float32) * 0.01
    x = jax.random.normal(keys[2 * C + 2], (N, G0, H, W), jnp.float32)

    out = rdb_forward(x, conv_ws, conv_bs, wb, bb)   # f32 compute: tight tolerance
    out = jax.block_until_ready(out)

    ref = jax.block_until_ready(rdb_reference(x, conv_ws, conv_bs, wb, bb))
    assert out.shape == (N, G0, H, W)
    assert jnp.allclose(out, ref, rtol=1e-4, atol=1e-4), \
        f"max abs err {jnp.max(jnp.abs(out - ref))}"

    print("KERNEL_OK")
</pallas_src>

<mosaic_0001>
module attributes {stable_mosaic.version = 11 : i64} {
  func.func @kernel(%arg0: i32, %arg1: memref<1x8x256xf32, #tpu.memory_space<vmem>>, %arg2: memref<9x1x256xf32, #tpu.memory_space<vmem>>, %arg3: memref<72x8xf32, #tpu.memory_space<vmem>>, %arg4: memref<72x16xf32, #tpu.memory_space<vmem>>, %arg5: memref<72x24xf32, #tpu.memory_space<vmem>>, %arg6: memref<3x8x1xf32, #tpu.memory_space<vmem>>, %arg7: memref<8x32xf32, #tpu.memory_space<vmem>>, %arg8: memref<8x1xf32, #tpu.memory_space<vmem>>, %arg9: memref<1x8x256xf32, #tpu.memory_space<vmem>>, %arg10: memref<32x256xf32, #tpu.memory_space<vmem>>) attributes {dimension_semantics = [#tpu.dimension_semantics<parallel>], iteration_bounds = array<i64: 2>, scalar_prefetch = 0 : i64, scratch_operands = 1 : i64, tpu.core_type = #tpu.core_type<tc>, window_params = [{transform_indices = @transform_0, window_bounds = array<i64: 1, 8, 256>}, {pipeline_mode = #tpu.pipeline_mode<synchronous>, transform_indices = @transform_1, window_bounds = array<i64: 9, 1, 256>}, {pipeline_mode = #tpu.pipeline_mode<synchronous>, transform_indices = @transform_2, window_bounds = array<i64: 72, 8>}, {pipeline_mode = #tpu.pipeline_mode<synchronous>, transform_indices = @transform_3, window_bounds = array<i64: 72, 16>}, {pipeline_mode = #tpu.pipeline_mode<synchronous>, transform_indices = @transform_4, window_bounds = array<i64: 72, 24>}, {pipeline_mode = #tpu.pipeline_mode<synchronous>, transform_indices = @transform_5, window_bounds = array<i64: 3, 8, 1>}, {pipeline_mode = #tpu.pipeline_mode<synchronous>, transform_indices = @transform_6, window_bounds = array<i64: 8, 32>}, {pipeline_mode = #tpu.pipeline_mode<synchronous>, transform_indices = @transform_7, window_bounds = array<i64: 8, 1>}, {transform_indices = @transform_8, window_bounds = array<i64: 1, 8, 256>}]} {
    %c0 = arith.constant 0 : index
    %c0_0 = arith.constant 0 : index
    %c0_1 = arith.constant 0 : index
    %0 = vector.load %arg1[%c0, %c0_0, %c0_1] : memref<1x8x256xf32, #tpu.memory_space<vmem>>, vector<1x8x256xf32>
    %1 = vector.shape_cast %0 : vector<1x8x256xf32> to vector<8x256xf32>
    %c0_2 = arith.constant 0 : index
    %c0_3 = arith.constant 0 : index
    %2 = vector.load %arg10[%c0_2, %c0_3] : memref<32x256xf32, #tpu.memory_space<vmem>>, vector<8x256xf32>
    tpu.vector_store %arg10[%c0_2, %c0_3], %1 {strides = array<i32>} : memref<32x256xf32, #tpu.memory_space<vmem>>, vector<8x256xf32>,
    %c0_4 = arith.constant 0 : index
    %c0_5 = arith.constant 0 : index
    %c0_6 = arith.constant 0 : index
    %3 = vector.load %arg2[%c0_4, %c0_5, %c0_6] : memref<9x1x256xf32, #tpu.memory_space<vmem>>, vector<9x1x256xf32>
    %c0_7 = arith.constant 0 : index
    %c0_8 = arith.constant 0 : index
    %c0_9 = arith.constant 0 : index
    %4 = vector.load %arg6[%c0_7, %c0_8, %c0_9] : memref<3x8x1xf32, #tpu.memory_space<vmem>>, vector<3x8x1xf32>
    %c0_10 = arith.constant 0 : index
    %c0_11 = arith.constant 0 : index
    %5 = vector.load %arg3[%c0_10, %c0_11] : memref<72x8xf32, #tpu.memory_space<vmem>>, vector<72x8xf32>
    %c0_12 = arith.constant 0 : index
    %c0_13 = arith.constant 0 : index
    %6 = vector.load %arg10[%c0_12, %c0_13] : memref<32x256xf32, #tpu.memory_space<vmem>>, vector<8x256xf32>
    %cst = arith.constant dense<0.000000e+00> : vector<72x256xf32>
    %7 = tpu.matmul %5, %6, %cst {dimension_numbers = #tpu.dot_dimension_numbers<[1], [0], [0], [1], [0, 0, 1, 1], [], []>} : vector<72x8xf32>, vector<8x256xf32>, vector<72x256xf32> -> vector<72x256xf32>
    %8 = vector.extract_strided_slice %7 {offsets = [32, 0], sizes = [8, 256], strides = [1, 1]} : vector<72x256xf32> to vector<8x256xf32>
    %9 = vector.extract_strided_slice %7 {offsets = [0, 0], sizes = [8, 256], strides = [1, 1]} : vector<72x256xf32> to vector<8x256xf32>
    %c17_i32 = arith.constant 17 : i32
    %10 = tpu.dynamic_rotate %9 by %c17_i32 dim 1 : vector<8x256xf32>, i32 -> vector<8x256xf32>
    %11 = vector.extract_strided_slice %3 {offsets = [0, 0, 0], sizes = [1, 1, 256], strides = [1, 1, 1]} : vector<9x1x256xf32> to vector<1x1x256xf32>
    %12 = vector.shape_cast %11 : vector<1x1x256xf32> to vector<1x256xf32>
    %13 = vector.broadcast %12 : vector<1x256xf32> to vector<8x256xf32>
    %14 = arith.mulf %10, %13 : vector<8x256xf32>
    %15 = arith.addf %8, %14 : vector<8x256xf32>
    %16 = vector.extract_strided_slice %7 {offsets = [8, 0], sizes = [8, 256], strides = [1, 1]} : vector<72x256xf32> to vector<8x256xf32>
    %c16_i32 = arith.constant 16 : i32
    %17 = tpu.dynamic_rotate %16 by %c16_i32 dim 1 : vector<8x256xf32>, i32 -> vector<8x256xf32>
    %18 = vector.extract_strided_slice %3 {offsets = [1, 0, 0], sizes = [1, 1, 256], strides = [1, 1, 1]} : vector<9x1x256xf32> to vector<1x1x256xf32>
    %19 = vector.shape_cast %18 : vector<1x1x256xf32> to vector<1x256xf32>
    %20 = vector.broadcast %19 : vector<1x256xf32> to vector<8x256xf32>
    %21 = arith.mulf %17, %20 : vector<8x256xf32>
    %22 = arith.addf %15, %21 : vector<8x256xf32>
    %23 = vector.extract_strided_slice %7 {offsets = [16, 0], sizes = [8, 256], strides = [1, 1]} : vector<72x256xf32> to vector<8x256xf32>
    %c15_i32 = arith.constant 15 : i32
    %24 = tpu.dynamic_rotate %23 by %c15_i32 dim 1 : vector<8x256xf32>, i32 -> vector<8x256xf32>
    %25 = vector.extract_strided_slice %3 {offsets = [2, 0, 0], sizes = [1, 1, 256], strides = [1, 1, 1]} : vector<9x1x256xf32> to vector<1x1x256xf32>
    %26 = vector.shape_cast %25 : vector<1x1x256xf32> to vector<1x256xf32>
    %27 = vector.broadcast %26 : vector<1x256xf32> to vector<8x256xf32>
    %28 = arith.mulf %24, %27 : vector<8x256xf32>
    %29 = arith.addf %22, %28 : vector<8x256xf32>
    %30 = vector.extract_strided_slice %7 {offsets = [24, 0], sizes = [8, 256], strides = [1, 1]} : vector<72x256xf32> to vector<8x256xf32>
    %c1_i32 = arith.constant 1 : i32
    %31 = tpu.dynamic_rotate %30 by %c1_i32 dim 1 : vector<8x256xf32>, i32 -> vector<8x256xf32>
    %32 = vector.extract_strided_slice %3 {offsets = [3, 0, 0], sizes = [1, 1, 256], strides = [1, 1, 1]} : vector<9x1x256xf32> to vector<1x1x256xf32>
    %33 = vector.shape_cast %32 : vector<1x1x256xf32> to vector<1x256xf32>
    %34 = vector.broadcast %33 : vector<1x256xf32> to vector<8x256xf32>
    %35 = arith.mulf %31, %34 : vector<8x256xf32>
    %36 = arith.addf %29, %35 : vector<8x256xf32>
    %37 = vector.extract_strided_slice %7 {offsets = [40, 0], sizes = [8, 256], strides = [1, 1]} : vector<72x256xf32> to vector<8x256xf32>
    %c255_i32 = arith.constant 255 : i32
    %38 = tpu.dynamic_rotate %37 by %c255_i32 dim 1 : vector<8x256xf32>, i32 -> vector<8x256xf32>
    %39 = vector.extract_strided_slice %3 {offsets = [5, 0, 0], sizes = [1, 1, 256], strides = [1, 1, 1]} : vector<9x1x256xf32> to vector<1x1x256xf32>
    %40 = vector.shape_cast %39 : vector<1x1x256xf32> to vector<1x256xf32>
    %41 = vector.broadcast %40 : vector<1x256xf32> to vector<8x256xf32>
    %42 = arith.mulf %38, %41 : vector<8x256xf32>
    %43 = arith.addf %36, %42 : vector<8x256xf32>
    %44 = vector.extract_strided_slice %7 {offsets = [48, 0], sizes = [8, 256], strides = [1, 1]} : vector<72x256xf32> to vector<8x256xf32>
    %c241_i32 = arith.constant 241 : i32
    %45 = tpu.dynamic_rotate %44 by %c241_i32 dim 1 : vector<8x256xf32>, i32 -> vector<8x256xf32>
    %46 = vector.extract_strided_slice %3 {offsets = [6, 0, 0], sizes = [1, 1, 256], strides = [1, 1, 1]} : vector<9x1x256xf32> to vector<1x1x256xf32>
    %47 = vector.shape_cast %46 : vector<1x1x256xf32> to vector<1x256xf32>
    %48 = vector.broadcast %47 : vector<1x256xf32> to vector<8x256xf32>
    %49 = arith.mulf %45, %48 : vector<8x256xf32>
    %50 = arith.addf %43, %49 : vector<8x256xf32>
    %51 = vector.extract_strided_slice %7 {offsets = [56, 0], sizes = [8, 256], strides = [1, 1]} : vector<72x256xf32> to vector<8x256xf32>
    %c240_i32 = arith.constant 240 : i32
    %52 = tpu.dynamic_rotate %51 by %c240_i32 dim 1 : vector<8x256xf32>, i32 -> vector<8x256xf32>
    %53 = vector.extract_strided_slice %3 {offsets = [7, 0, 0], sizes = [1, 1, 256], strides = [1, 1, 1]} : vector<9x1x256xf32> to vector<1x1x256xf32>
    %54 = vector.shape_cast %53 : vector<1x1x256xf32> to vector<1x256xf32>
    %55 = vector.broadcast %54 : vector<1x256xf32> to vector<8x256xf32>
    %56 = arith.mulf %52, %55 : vector<8x256xf32>
    %57 = arith.addf %50, %56 : vector<8x256xf32>
    %58 = vector.extract_strided_slice %7 {offsets = [64, 0], sizes = [8, 256], strides = [1, 1]} : vector<72x256xf32> to vector<8x256xf32>
    %c239_i32 = arith.constant 239 : i32
    %59 = tpu.dynamic_rotate %58 by %c239_i32 dim 1 : vector<8x256xf32>, i32 -> vector<8x256xf32>
    %60 = vector.extract_strided_slice %3 {offsets = [8, 0, 0], sizes = [1, 1, 256], strides = [1, 1, 1]} : vector<9x1x256xf32> to vector<1x1x256xf32>
    %61 = vector.shape_cast %60 : vector<1x1x256xf32> to vector<1x256xf32>
    %62 = vector.broadcast %61 : vector<1x256xf32> to vector<8x256xf32>
    %63 = arith.mulf %59, %62 : vector<8x256xf32>
    %64 = arith.addf %57, %63 : vector<8x256xf32>
    %65 = vector.extract_strided_slice %4 {offsets = [0, 0, 0], sizes = [1, 8, 1], strides = [1, 1, 1]} : vector<3x8x1xf32> to vector<1x8x1xf32>
    %66 = vector.shape_cast %65 : vector<1x8x1xf32> to vector<8x1xf32>
    %67 = vector.broadcast %66 : vector<8x1xf32> to vector<8x256xf32>
    %68 = arith.addf %64, %67 : vector<8x256xf32>
    %cst_14 = arith.constant 0.000000e+00 : f32
    %69 = vector.broadcast %cst_14 : f32 to vector<8x256xf32>
    %70 = arith.maximumf %68, %69 : vector<8x256xf32>
    %c8 = arith.constant 8 : index
    %c0_15 = arith.constant 0 : index
    %71 = vector.load %arg10[%c8, %c0_15] : memref<32x256xf32, #tpu.memory_space<vmem>>, vector<8x256xf32>
    tpu.vector_store %arg10[%c8, %c0_15], %70 {strides = array<i32>} : memref<32x256xf32, #tpu.memory_space<vmem>>, vector<8x256xf32>,
    %c0_16 = arith.constant 0 : index
    %c0_17 = arith.constant 0 : index
    %72 = vector.load %arg4[%c0_16, %c0_17] : memref<72x16xf32, #tpu.memory_space<vmem>>, vector<72x16xf32>
    %c0_18 = arith.constant 0 : index
    %c0_19 = arith.constant 0 : index
    %73 = vector.load %arg10[%c0_18, %c0_19] : memref<32x256xf32, #tpu.memory_space<vmem>>, vector<16x256xf32>
    %cst_20 = arith.constant dense<0.000000e+00> : vector<72x256xf32>
    %74 = tpu.matmul %72, %73, %cst_20 {dimension_numbers = #tpu.dot_dimension_numbers<[1], [0], [0], [1], [0, 0, 1, 1], [], []>} : vector<72x16xf32>, vector<16x256xf32>, vector<72x256xf32> -> vector<72x256xf32>
    %75 = vector.extract_strided_slice %74 {offsets = [32, 0], sizes = [8, 256], strides = [1, 1]} : vector<72x256xf32> to vector<8x256xf32>
    %76 = vector.extract_strided_slice %74 {offsets = [0, 0], sizes = [8, 256], strides = [1, 1]} : vector<72x256xf32> to vector<8x256xf32>
    %c17_i32_21 = arith.constant 17 : i32
    %77 = tpu.dynamic_rotate %76 by %c17_i32_21 dim 1 : vector<8x256xf32>, i32 -> vector<8x256xf32>
    %78 = vector.extract_strided_slice %3 {offsets = [0, 0, 0], sizes = [1, 1, 256], strides = [1, 1, 1]} : vector<9x1x256xf32> to vector<1x1x256xf32>
    %79 = vector.shape_cast %78 : vector<1x1x256xf32> to vector<1x256xf32>
    %80 = vector.broadcast %79 : vector<1x256xf32> to vector<8x256xf32>
    %81 = arith.mulf %77, %80 : vector<8x256xf32>
    %82 = arith.addf %75, %81 : vector<8x256xf32>
    %83 = vector.extract_strided_slice %74 {offsets = [8, 0], sizes = [8, 256], strides = [1, 1]} : vector<72x256xf32> to vector<8x256xf32>
    %c16_i32_22 = arith.constant 16 : i32
    %84 = tpu.dynamic_rotate %83 by %c16_i32_22 dim 1 : vector<8x256xf32>, i32 -> vector<8x256xf32>
    %85 = vector.extract_strided_slice %3 {offsets = [1, 0, 0], sizes = [1, 1, 256], strides = [1, 1, 1]} : vector<9x1x256xf32> to vector<1x1x256xf32>
    %86 = vector.shape_cast %85 : vector<1x1x256xf32> to vector<1x256xf32>
    %87 = vector.broadcast %86 : vector<1x256xf32> to vector<8x256xf32>
    %88 = arith.mulf %84, %87 : vector<8x256xf32>
    %89 = arith.addf %82, %88 : vector<8x256xf32>
    %90 = vector.extract_strided_slice %74 {offsets = [16, 0], sizes = [8, 256], strides = [1, 1]} : vector<72x256xf32> to vector<8x256xf32>
    %c15_i32_23 = arith.constant 15 : i32
    %91 = tpu.dynamic_rotate %90 by %c15_i32_23 dim 1 : vector<8x256xf32>, i32 -> vector<8x256xf32>
    %92 = vector.extract_strided_slice %3 {offsets = [2, 0, 0], sizes = [1, 1, 256], strides = [1, 1, 1]} : vector<9x1x256xf32> to vector<1x1x256xf32>
    %93 = vector.shape_cast %92 : vector<1x1x256xf32> to vector<1x256xf32>
    %94 = vector.broadcast %93 : vector<1x256xf32> to vector<8x256xf32>
    %95 = arith.mulf %91, %94 : vector<8x256xf32>
    %96 = arith.addf %89, %95 : vector<8x256xf32>
    %97 = vector.extract_strided_slice %74 {offsets = [24, 0], sizes = [8, 256], strides = [1, 1]} : vector<72x256xf32> to vector<8x256xf32>
    %c1_i32_24 = arith.constant 1 : i32
    %98 = tpu.dynamic_rotate %97 by %c1_i32_24 dim 1 : vector<8x256xf32>, i32 -> vector<8x256xf32>
    %99 = vector.extract_strided_slice %3 {offsets = [3, 0, 0], sizes = [1, 1, 256], strides = [1, 1, 1]} : vector<9x1x256xf32> to vector<1x1x256xf32>
    %100 = vector.shape_cast %99 : vector<1x1x256xf32> to vector<1x256xf32>
    %101 = vector.broadcast %100 : vector<1x256xf32> to vector<8x256xf32>
    %102 = arith.mulf %98, %101 : vector<8x256xf32>
    %103 = arith.addf %96, %102 : vector<8x256xf32>
    %104 = vector.extract_strided_slice %74 {offsets = [40, 0], sizes = [8, 256], strides = [1, 1]} : vector<72x256xf32> to vector<8x256xf32>
    %c255_i32_25 = arith.constant 255 : i32
    %105 = tpu.dynamic_rotate %104 by %c255_i32_25 dim 1 : vector<8x256xf32>, i32 -> vector<8x256xf32>
    %106 = vector.extract_strided_slice %3 {offsets = [5, 0, 0], sizes = [1, 1, 256], strides = [1, 1, 1]} : vector<9x1x256xf32> to vector<1x1x256xf32>
    %107 = vector.shape_cast %106 : vector<1x1x256xf32> to vector<1x256xf32>
    %108 = vector.broadcast %107 : vector<1x256xf32> to vector<8x256xf32>
    %109 = arith.mulf %105, %108 : vector<8x256xf32>
    %110 = arith.addf %103, %109 : vector<8x256xf32>
    %111 = vector.extract_strided_slice %74 {offsets = [48, 0], sizes = [8, 256], strides = [1, 1]} : vector<72x256xf32> to vector<8x256xf32>
    %c241_i32_26 = arith.constant 241 : i32
    %112 = tpu.dynamic_rotate %111 by %c241_i32_26 dim 1 : vector<8x256xf32>, i32 -> vector<8x256xf32>
    %113 = vector.extract_strided_slice %3 {offsets = [6, 0, 0], sizes = [1, 1, 256], strides = [1, 1, 1]} : vector<9x1x256xf32> to vector<1x1x256xf32>
    %114 = vector.shape_cast %113 : vector<1x1x256xf32> to vector<1x256xf32>
    %115 = vector.broadcast %114 : vector<1x256xf32> to vector<8x256xf32>
    %116 = arith.mulf %112, %115 : vector<8x256xf32>
    %117 = arith.addf %110, %116 : vector<8x256xf32>
    %118 = vector.extract_strided_slice %74 {offsets = [56, 0], sizes = [8, 256], strides = [1, 1]} : vector<72x256xf32> to vector<8x256xf32>
    %c240_i32_27 = arith.constant 240 : i32
    %119 = tpu.dynamic_rotate %118 by %c240_i32_27 dim 1 : vector<8x256xf32>, i32 -> vector<8x256xf32>
    %120 = vector.extract_strided_slice %3 {offsets = [7, 0, 0], sizes = [1, 1, 256], strides = [1, 1, 1]} : vector<9x1x256xf32> to vector<1x1x256xf32>
    %121 = vector.shape_cast %120 : vector<1x1x256xf32> to vector<1x256xf32>
    %122 = vector.broadcast %121 : vector<1x256xf32> to vector<8x256xf32>
    %123 = arith.mulf %119, %122 : vector<8x256xf32>
    %124 = arith.addf %117, %123 : vector<8x256xf32>
    %125 = vector.extract_strided_slice %74 {offsets = [64, 0], sizes = [8, 256], strides = [1, 1]} : vector<72x256xf32> to vector<8x256xf32>
    %c239_i32_28 = arith.constant 239 : i32
    %126 = tpu.dynamic_rotate %125 by %c239_i32_28 dim 1 : vector<8x256xf32>, i32 -> vector<8x256xf32>
    %127 = vector.extract_strided_slice %3 {offsets = [8, 0, 0], sizes = [1, 1, 256], strides = [1, 1, 1]} : vector<9x1x256xf32> to vector<1x1x256xf32>
    %128 = vector.shape_cast %127 : vector<1x1x256xf32> to vector<1x256xf32>
    %129 = vector.broadcast %128 : vector<1x256xf32> to vector<8x256xf32>
    %130 = arith.mulf %126, %129 : vector<8x256xf32>
    %131 = arith.addf %124, %130 : vector<8x256xf32>
    %132 = vector.extract_strided_slice %4 {offsets = [1, 0, 0], sizes = [1, 8, 1], strides = [1, 1, 1]} : vector<3x8x1xf32> to vector<1x8x1xf32>
    %133 = vector.shape_cast %132 : vector<1x8x1xf32> to vector<8x1xf32>
    %134 = vector.broadcast %133 : vector<8x1xf32> to vector<8x256xf32>
    %135 = arith.addf %131, %134 : vector<8x256xf32>
    %cst_29 = arith.constant 0.000000e+00 : f32
    %136 = vector.broadcast %cst_29 : f32 to vector<8x256xf32>
    %137 = arith.maximumf %135, %136 : vector<8x256xf32>
    %c16 = arith.constant 16 : index
    %c0_30 = arith.constant 0 : index
    %138 = vector.load %arg10[%c16, %c0_30] : memref<32x256xf32, #tpu.memory_space<vmem>>, vector<8x256xf32>
    tpu.vector_store %arg10[%c16, %c0_30], %137 {strides = array<i32>} : memref<32x256xf32, #tpu.memory_space<vmem>>, vector<8x256xf32>,
    %c0_31 = arith.constant 0 : index
    %c0_32 = arith.constant 0 : index
    %139 = vector.load %arg5[%c0_31, %c0_32] : memref<72x24xf32, #tpu.memory_space<vmem>>, vector<72x24xf32>
    %c0_33 = arith.constant 0 : index
    %c0_34 = arith.constant 0 : index
    %140 = vector.load %arg10[%c0_33, %c0_34] : memref<32x256xf32, #tpu.memory_space<vmem>>, vector<24x256xf32>
    %cst_35 = arith.constant dense<0.000000e+00> : vector<72x256xf32>
    %141 = tpu.matmul %139, %140, %cst_35 {dimension_numbers = #tpu.dot_dimension_numbers<[1], [0], [0], [1], [0, 0, 1, 1], [], []>} : vector<72x24xf32>, vector<24x256xf32>, vector<72x256xf32> -> vector<72x256xf32>
    %142 = vector.extract_strided_slice %141 {offsets = [32, 0], sizes = [8, 256], strides = [1, 1]} : vector<72x256xf32> to vector<8x256xf32>
    %143 = vector.extract_strided_slice %141 {offsets = [0, 0], sizes = [8, 256], strides = [1, 1]} : vector<72x256xf32> to vector<8x256xf32>
    %c17_i32_36 = arith.constant 17 : i32
    %144 = tpu.dynamic_rotate %143 by %c17_i32_36 dim 1 : vector<8x256xf32>, i32 -> vector<8x256xf32>
    %145 = vector.extract_strided_slice %3 {offsets = [0, 0, 0], sizes = [1, 1, 256], strides = [1, 1, 1]} : vector<9x1x256xf32> to vector<1x1x256xf32>
    %146 = vector.shape_cast %145 : vector<1x1x256xf32> to vector<1x256xf32>
    %147 = vector.broadcast %146 : vector<1x256xf32> to vector<8x256xf32>
    %148 = arith.mulf %144, %147 : vector<8x256xf32>
    %149 = arith.addf %142, %148 : vector<8x256xf32>
    %150 = vector.extract_strided_slice %141 {offsets = [8, 0], sizes = [8, 256], strides = [1, 1]} : vector<72x256xf32> to vector<8x256xf32>
    %c16_i32_37 = arith.constant 16 : i32
    %151 = tpu.dynamic_rotate %150 by %c16_i32_37 dim 1 : vector<8x256xf32>, i32 -> vector<8x256xf32>
    %152 = vector.extract_strided_slice %3 {offsets = [1, 0, 0], sizes = [1, 1, 256], strides = [1, 1, 1]} : vector<9x1x256xf32> to vector<1x1x256xf32>
    %153 = vector.shape_cast %152 : vector<1x1x256xf32> to vector<1x256xf32>
    %154 = vector.broadcast %153 : vector<1x256xf32> to vector<8x256xf32>
    %155 = arith.mulf %151, %154 : vector<8x256xf32>
    %156 = arith.addf %149, %155 : vector<8x256xf32>
    %157 = vector.extract_strided_slice %141 {offsets = [16, 0], sizes = [8, 256], strides = [1, 1]} : vector<72x256xf32> to vector<8x256xf32>
    %c15_i32_38 = arith.constant 15 : i32
    %158 = tpu.dynamic_rotate %157 by %c15_i32_38 dim 1 : vector<8x256xf32>, i32 -> vector<8x256xf32>
    %159 = vector.extract_strided_slice %3 {offsets = [2, 0, 0], sizes = [1, 1, 256], strides = [1, 1, 1]} : vector<9x1x256xf32> to vector<1x1x256xf32>
    %160 = vector.shape_cast %159 : vector<1x1x256xf32> to vector<1x256xf32>
    %161 = vector.broadcast %160 : vector<1x256xf32> to vector<8x256xf32>
    %162 = arith.mulf %158, %161 : vector<8x256xf32>
    %163 = arith.addf %156, %162 : vector<8x256xf32>
    %164 = vector.extract_strided_slice %141 {offsets = [24, 0], sizes = [8, 256], strides = [1, 1]} : vector<72x256xf32> to vector<8x256xf32>
    %c1_i32_39 = arith.constant 1 : i32
    %165 = tpu.dynamic_rotate %164 by %c1_i32_39 dim 1 : vector<8x256xf32>, i32 -> vector<8x256xf32>
    %166 = vector.extract_strided_slice %3 {offsets = [3, 0, 0], sizes = [1, 1, 256], strides = [1, 1, 1]} : vector<9x1x256xf32> to vector<1x1x256xf32>
    %167 = vector.shape_cast %166 : vector<1x1x256xf32> to vector<1x256xf32>
    %168 = vector.broadcast %167 : vector<1x256xf32> to vector<8x256xf32>
    %169 = arith.mulf %165, %168 : vector<8x256xf32>
    %170 = arith.addf %163, %169 : vector<8x256xf32>
    %171 = vector.extract_strided_slice %141 {offsets = [40, 0], sizes = [8, 256], strides = [1, 1]} : vector<72x256xf32> to vector<8x256xf32>
    %c255_i32_40 = arith.constant 255 : i32
    %172 = tpu.dynamic_rotate %171 by %c255_i32_40 dim 1 : vector<8x256xf32>, i32 -> vector<8x256xf32>
    %173 = vector.extract_strided_slice %3 {offsets = [5, 0, 0], sizes = [1, 1, 256], strides = [1, 1, 1]} : vector<9x1x256xf32> to vector<1x1x256xf32>
    %174 = vector.shape_cast %173 : vector<1x1x256xf32> to vector<1x256xf32>
    %175 = vector.broadcast %174 : vector<1x256xf32> to vector<8x256xf32>
    %176 = arith.mulf %172, %175 : vector<8x256xf32>
    %177 = arith.addf %170, %176 : vector<8x256xf32>
    %178 = vector.extract_strided_slice %141 {offsets = [48, 0], sizes = [8, 256], strides = [1, 1]} : vector<72x256xf32> to vector<8x256xf32>
    %c241_i32_41 = arith.constant 241 : i32
    %179 = tpu.dynamic_rotate %178 by %c241_i32_41 dim 1 : vector<8x256xf32>, i32 -> vector<8x256xf32>
    %180 = vector.extract_strided_slice %3 {offsets = [6, 0, 0], sizes = [1, 1, 256], strides = [1, 1, 1]} : vector<9x1x256xf32> to vector<1x1x256xf32>
    %181 = vector.shape_cast %180 : vector<1x1x256xf32> to vector<1x256xf32>
    %182 = vector.broadcast %181 : vector<1x256xf32> to vector<8x256xf32>
    %183 = arith.mulf %179, %182 : vector<8x256xf32>
    %184 = arith.addf %177, %183 : vector<8x256xf32>
    %185 = vector.extract_strided_slice %141 {offsets = [56, 0], sizes = [8, 256], strides = [1, 1]} : vector<72x256xf32> to vector<8x256xf32>
    %c240_i32_42 = arith.constant 240 : i32
    %186 = tpu.dynamic_rotate %185 by %c240_i32_42 dim 1 : vector<8x256xf32>, i32 -> vector<8x256xf32>
    %187 = vector.extract_strided_slice %3 {offsets = [7, 0, 0], sizes = [1, 1, 256], strides = [1, 1, 1]} : vector<9x1x256xf32> to vector<1x1x256xf32>
    %188 = vector.shape_cast %187 : vector<1x1x256xf32> to vector<1x256xf32>
    %189 = vector.broadcast %188 : vector<1x256xf32> to vector<8x256xf32>
    %190 = arith.mulf %186, %189 : vector<8x256xf32>
    %191 = arith.addf %184, %190 : vector<8x256xf32>
    %192 = vector.extract_strided_slice %141 {offsets = [64, 0], sizes = [8, 256], strides = [1, 1]} : vector<72x256xf32> to vector<8x256xf32>
    %c239_i32_43 = arith.constant 239 : i32
    %193 = tpu.dynamic_rotate %192 by %c239_i32_43 dim 1 : vector<8x256xf32>, i32 -> vector<8x256xf32>
    %194 = vector.extract_strided_slice %3 {offsets = [8, 0, 0], sizes = [1, 1, 256], strides = [1, 1, 1]} : vector<9x1x256xf32> to vector<1x1x256xf32>
    %195 = vector.shape_cast %194 : vector<1x1x256xf32> to vector<1x256xf32>
    %196 = vector.broadcast %195 : vector<1x256xf32> to vector<8x256xf32>
    %197 = arith.mulf %193, %196 : vector<8x256xf32>
    %198 = arith.addf %191, %197 : vector<8x256xf32>
    %199 = vector.extract_strided_slice %4 {offsets = [2, 0, 0], sizes = [1, 8, 1], strides = [1, 1, 1]} : vector<3x8x1xf32> to vector<1x8x1xf32>
    %200 = vector.shape_cast %199 : vector<1x8x1xf32> to vector<8x1xf32>
    %201 = vector.broadcast %200 : vector<8x1xf32> to vector<8x256xf32>
    %202 = arith.addf %198, %201 : vector<8x256xf32>
    %cst_44 = arith.constant 0.000000e+00 : f32
    %203 = vector.broadcast %cst_44 : f32 to vector<8x256xf32>
    %204 = arith.maximumf %202, %203 : vector<8x256xf32>
    %c24 = arith.constant 24 : index
    %c0_45 = arith.constant 0 : index
    %205 = vector.load %arg10[%c24, %c0_45] : memref<32x256xf32, #tpu.memory_space<vmem>>, vector<8x256xf32>
    tpu.vector_store %arg10[%c24, %c0_45], %204 {strides = array<i32>} : memref<32x256xf32, #tpu.memory_space<vmem>>, vector<8x256xf32>,
    %c0_46 = arith.constant 0 : index
    %c0_47 = arith.constant 0 : index
    %206 = vector.load %arg7[%c0_46, %c0_47] : memref<8x32xf32, #tpu.memory_space<vmem>>, vector<8x32xf32>
    %c0_48 = arith.constant 0 : index
    %c0_49 = arith.constant 0 : index
    %207 = vector.load %arg10[%c0_48, %c0_49] : memref<32x256xf32, #tpu.memory_space<vmem>>, vector<32x256xf32>
    %cst_50 = arith.constant dense<0.000000e+00> : vector<8x256xf32>
    %208 = tpu.matmul %206, %207, %cst_50 {dimension_numbers = #tpu.dot_dimension_numbers<[1], [0], [0], [1], [0, 0, 1, 1], [], []>} : vector<8x32xf32>, vector<32x256xf32>, vector<8x256xf32> -> vector<8x256xf32>
    %c0_51 = arith.constant 0 : index
    %c0_52 = arith.constant 0 : index
    %209 = vector.load %arg8[%c0_51, %c0_52] : memref<8x1xf32, #tpu.memory_space<vmem>>, vector<8x1xf32>
    %210 = vector.broadcast %209 : vector<8x1xf32> to vector<8x256xf32>
    %211 = arith.addf %208, %210 : vector<8x256xf32>
    %212 = arith.addf %211, %1 : vector<8x256xf32>
    %c0_53 = arith.constant 0 : index
    %c0_54 = arith.constant 0 : index
    %c0_55 = arith.constant 0 : index
    %213 = vector.load %arg9[%c0_53, %c0_54, %c0_55] : memref<1x8x256xf32, #tpu.memory_space<vmem>>, vector<1x8x256xf32>
    %214 = vector.shape_cast %213 : vector<1x8x256xf32> to vector<8x256xf32>
    %215 = vector.shape_cast %212 : vector<8x256xf32> to vector<1x8x256xf32>
    tpu.vector_store %arg9[%c0_53, %c0_54, %c0_55], %215 {strides = array<i32>} : memref<1x8x256xf32, #tpu.memory_space<vmem>>, vector<1x8x256xf32>,
    return
  }
  func.func @transform_0(%arg0: i32) -> (i32, i32, i32) {
    %c0_i32 = arith.constant 0 : i32
    %c0_i32_0 = arith.constant 0 : i32
    %c0_i32_1 = arith.constant 0 : i32
    return %arg0, %c0_i32, %c0_i32_0 : i32, i32, i32
  }
  func.func @transform_1(%arg0: i32) -> (i32, i32, i32) {
    %c0_i32 = arith.constant 0 : i32
    %c0_i32_0 = arith.constant 0 : i32
    %c0_i32_1 = arith.constant 0 : i32
    %c0_i32_2 = arith.constant 0 : i32
    return %c0_i32, %c0_i32_0, %c0_i32_1 : i32, i32, i32
  }
  func.func @transform_2(%arg0: i32) -> (i32, i32) {
    %c0_i32 = arith.constant 0 : i32
    %c0_i32_0 = arith.constant 0 : i32
    %c0_i32_1 = arith.constant 0 : i32
    return %c0_i32, %c0_i32_0 : i32, i32
  }
  func.func @transform_3(%arg0: i32) -> (i32, i32) {
    %c0_i32 = arith.constant 0 : i32
    %c0_i32_0 = arith.constant 0 : i32
    %c0_i32_1 = arith.constant 0 : i32
    return %c0_i32, %c0_i32_0 : i32, i32
  }
  func.func @transform_4(%arg0: i32) -> (i32, i32) {
    %c0_i32 = arith.constant 0 : i32
    %c0_i32_0 = arith.constant 0 : i32
    %c0_i32_1 = arith.constant 0 : i32
    return %c0_i32, %c0_i32_0 : i32, i32
  }
  func.func @transform_5(%arg0: i32) -> (i32, i32, i32) {
    %c0_i32 = arith.constant 0 : i32
    %c0_i32_0 = arith.constant 0 : i32
    %c0_i32_1 = arith.constant 0 : i32
    %c0_i32_2 = arith.constant 0 : i32
    return %c0_i32, %c0_i32_0, %c0_i32_1 : i32, i32, i32
  }
  func.func @transform_6(%arg0: i32) -> (i32, i32) {
    %c0_i32 = arith.constant 0 : i32
    %c0_i32_0 = arith.constant 0 : i32
    %c0_i32_1 = arith.constant 0 : i32
    return %c0_i32, %c0_i32_0 : i32, i32
  }
  func.func @transform_7(%arg0: i32) -> (i32, i32) {
    %c0_i32 = arith.constant 0 : i32
    %c0_i32_0 = arith.constant 0 : i32
    %c0_i32_1 = arith.constant 0 : i32
    return %c0_i32, %c0_i32_0 : i32, i32
  }
  func.func @transform_8(%arg0: i32) -> (i32, i32, i32) {
    %c0_i32 = arith.constant 0 : i32
    %c0_i32_0 = arith.constant 0 : i32
    %c0_i32_1 = arith.constant 0 : i32
    return %arg0, %c0_i32, %c0_i32_0 : i32, i32, i32
  }
}

</mosaic_0001>

<bundles_post_ra>
// kernel: tpu_custom_call.1
= control target key start
LH: loop header
LB: loop body
LE: loop exit
PB: predicated region body
PF: predicated region fallthrough
CT: control target
= control target key end

     0   :  { %13 = vsyncpa [#allocation4], 0  ;;  %s2107_s0 = inlined_call_operand.vmem [shape: f32[2,8,256], index: 0, kind: input, shape index: {}]   ;;  %s2108_s1 = inlined_call_operand.vmem [shape: f32[9,1,256], index: 1, kind: input, shape index: {}]   ;;  %s2109_s2 = inlined_call_operand.vmem [shape: f32[72,8], index: 2, kind: input, shape index: {}]   ;;  %s2110_s3 = inlined_call_operand.vmem [shape: f32[72,16], index: 3, kind: input, shape index: {}]   ;;  %s2111_s4 = inlined_call_operand.vmem [shape: f32[72,24], index: 4, kind: input, shape index: {}]   ;;  %s2112_s5 = inlined_call_operand.vmem [shape: f32[3,8,1], index: 5, kind: input, shape index: {}]   ;;  %s2113_s6 = inlined_call_operand.vmem [shape: f32[8,32], index: 6, kind: input, shape index: {}]   ;;  %s2114_s7 = inlined_call_operand.vmem [shape: f32[8,1], index: 7, kind: input, shape index: {}]   ;;  %s2115_s8 = inlined_call_operand.hbm [shape: f32[2,8,256], index: 8, kind: output, shape index: {}]  }
   0x1   :  { %15 = vsyncpa [#allocation4 + $0x1], 0  ;;  %s1551_s27 = smov 0   ;;  %s1553_s28 = smov 0  }
   0x2   :  { %s1555_s29 = smov 0   ;;  %s1557_s30 = smov 0  }
   0x3 LB: > { %s1572_s9 = sadd.s32 4294967295, %s1493_s30   ;;  %s1338_s10 = sadd.s32 4294967294, %s1493_s30   ;;  %s1493_s30 = sphi %s1557_s30, %s2127_s30   ;;  %s1489_s29 = sphi %s1555_s29, %s2126_s29   ;;  %s1485_s28 = sphi %s1553_s28, %s2125_s28   ;;  %s1481_s27 = sphi %s1551_s27, %s2124_s27  }
   0x4   : > { %s1576_s11 = sadd.s32 1, %s1493_s30   ;;  %s201_s12 = sadd.s32 1, %s1489_s29 }
   0x5   : > { %s198_s13 = ssub.s32 %s1493_s30, %s1576_s11  ;;  %p211_p0 = scmp.ne.s32.totalorder %s1489_s29, %s1485_s28 }
   0x6   : > { %p199_p1 = scmp.eq.s32.totalorder %s198_s13, 0  ;;  %p212_p2 = scmp.eq.s32.totalorder %s1572_s9, 1 }
   0x7   : > { %p217_p3 = scmp.ne.s32.totalorder %s1485_s28, %s1481_s27  ;;  %p218_p4 = scmp.eq.s32.totalorder %s1338_s10, 1 }
   0x8   : > { %s1587_s14 = scalar_select %p199_p1, %s1489_s29, %s201_s12  }
   0x9   : > { %p1589_p5 = por %p212_p2, %p211_p0  ;;  %p1593_p6 = por %p218_p4, %p217_p3 }
   0xa   : > { %p1341_p7 = scmp.ge.s32.totalorder %s1493_s30, 1  ;;  %p265_p8 = scmp.lt.s32.totalorder %s1493_s30, 3 }
   0xc   : > { %p266_p9 = pnand %p1341_p7, %p265_p8 }
   0xd   : > { %p299_p10 = scmp.lt.s32.totalorder (!%p266_p9), %s1572_s9, 1  ;;  %s1497_s10 = smov (!%p266_p9), 17  }
   0xe   : > { %269 = sbr.rel (%p266_p9) target bundleno = 1323 (0x52b), region = 52  ;;  %s1498_s12 = smov (!%p266_p9), 127  }
   0xf   : > { %s1499_s13 = smov (!%p266_p9), 16   ;;  %s2118_s19 = smov (!%p266_p9), 112  }
  0x10   : > { %s1503_s20 = smov (!%p266_p9), 1   ;;  %s2122_s23 = smov (!%p266_p9), 111  }
  0x11   : > { %s1379_s22 = sshll.u32 (!%p266_p9), %s1572_s9, 8 }
  0x13   : > { %v1495_v0 = vmov 0.0   ;;  %s300_s17 = scalar_select %p299_p10, %s1572_s9, 1  ;;  %v319_v1 = vld [vmem:[%s2109_s2] sm:$0xff]  ;;  %vm330_vm0 = vcmask 64512   ;;  %v324_v4 = vld [vmem:[%s2109_s2 + $0x28] sm:$0xff]  ;;  %v325_v6 = vld [vmem:[%s2109_s2 + $0x30] sm:$0xff]  ;;  %v481_v32 = vlaneseq }
  0x14   : > { %422 = vmatprep.mubr.f32.mxu0 %v1495_v0  ;;  %452 = vmatprep.mubr.f32.mxu1 %v1495_v0  ;;  %v320_v5 = vld [vmem:[%s2109_s2 + $0x8] sm:$0xff]  ;;  %v321_v7 = vld [vmem:[%s2109_s2 + $0x10] sm:$0xff]  ;;  %v326_v8 = vld [vmem:[%s2109_s2 + $0x38] sm:$0xff]  ;;  %v1496_v12 = vmov 0   ;;  %vm679_vm9 = vcmask 130048   ;;  %vm932_vm10 = vcmask 195584  }
  0x15   : > { %s1378_s18 = sshll.u32 %s300_s17, 4  ;;  %v322_v9 = vld [vmem:[%s2109_s2 + $0x18] sm:$0xff]  ;;  %v327_v10 = vld [vmem:[%s2109_s2 + $0x40] sm:$0xff]  ;;  %1431 = vset.pattern.permute.xlu0 %v1496_v12  ;;  %1432 = vset.pattern.permute.xlu1 %v1496_v12  ;;  %s1500_s17 = smov 113   ;;  %v488_v34 = vshrl.u32 %v481_v32, 7  ;;  %v1678_v36 = vand.u32 127, %v481_v32 }
  0x16   : > { %s303_s21 = scalar_lea.vmem %s2107_s0, %s1378_s18  ;;  %v323_v11 = vld [vmem:[%s2109_s2 + $0x20] sm:$0xff]  ;;  %s1501_s18 = smov 15   ;;  %v314_v32 = vld [vmem:[%s2108_s1 + $0xe] sm:$0x3]  ;;  %vm1185_vm11 = vcmask 261120  }
  0x17   : > { %v1609_v2 = vld [vmem:[%s303_s21 + $0x8] sm:$0xff]  ;;  %v1611_v3 = vld [vmem:[%s303_s21] sm:$0xff]  ;;  %s2116_s21 = smov 111   ;;  %v1683_v39 = vsub.s32 0, %v488_v34  ;;  %v1685_v40 = vsub.s32 1, %v488_v34  ;;  %vm483_vm1 = vcmp.lt.s32.totalorder %v1678_v36, 17 }
  0x18   : > { %388 = vmatprep.subr.mxu0 %v1609_v2  ;;  %1380 = vmatprep.subr.mxu1 %v1609_v2  ;;  %v316_v29 = vld [vmem:[%s2112_s5] sm:$0xff]  ;;  %vm505_vm2 = vcmp.lt.s32.totalorder %v1678_v36, 16  ;;  %vm527_vm3 = vcmp.lt.s32.totalorder %v1678_v36, 15  ;;  %vm571_vm4 = vcmp.lt.s32.totalorder %v1678_v36, 127  ;;  %vm549_vm5 = vcmp.lt.s32.totalorder %v1678_v36, 1  ;;  %s1505_s9 = smov [#allocation3]  }
  0x19   : > { %389 = vmatpush1.msra.mxu0 %v1611_v3  ;;  %1381 = vmatpush1.msra.mxu1 %v1611_v3  ;;  %v308_v38 = vld [vmem:[%s2108_s1] sm:$0x3]  ;;  %v309_v43 = vld [vmem:[%s2108_s1 + $0x2] sm:$0x3]  ;;  %v310_v51 = vld [vmem:[%s2108_s1 + $0x4] sm:$0x3] }
  0x1a   : > { %1345 = vmatmul.mubr.msk.f32.vlgmr.msra.gmra.mxu0 %vm330_vm0, %v319_v1  ;;  %1350 = vmatmul.mubr.msk.f32.vlgmr.msra.gmra.mxu1 %vm330_vm0, %v324_v4  ;;  %v1689_v42 = vrot.slane %v308_v38, %v1683_v39  ;;  %v1695_v44 = vrot.slane %v308_v38, %v1685_v40  ;;  %v1703_v50 = vrot.slane %v309_v43, %v1683_v39  ;;  %v311_v1 = vld [vmem:[%s2108_s1 + $0x6] sm:$0x3]  ;;  %v312_v4 = vld [vmem:[%s2108_s1 + $0xa] sm:$0x3]  ;;  %vm593_vm6 = vcmp.lt.s32.totalorder %v1678_v36, 113 }
  0x1b   : > { %428 = vmatprep.mubr.f32.mxu0 %v1495_v0  ;;  %458 = vmatprep.mubr.f32.mxu1 %v1495_v0  ;;  %v1710_v53 = vrot.slane %v309_v43, %v1685_v40  ;;  %v1719_v59 = vrot.slane %v310_v51, %v1683_v39  ;;  %v1722_v60 = vrot.slane %v310_v51, %v1685_v40  ;;  %vm615_vm7 = vcmp.lt.s32.totalorder %v1678_v36, 112 }
  0x1c   : > { %v1783_v43 = vrot.slane %v314_v32, %v1683_v39  ;;  %vm637_vm8 = vcmp.lt.s32.totalorder %v1678_v36, 111 }
  0x1e   : > { %1346 = vmatmul.mubr.msk.f32.gmra.mxu0 %vm330_vm0, %v320_v5  ;;  %1351 = vmatmul.mubr.msk.f32.gmra.mxu1 %vm330_vm0, %v325_v6 }
  0x1f   : > { %434 = vmatprep.mubr.f32.mxu0 %v1495_v0  ;;  %464 = vmatprep.mubr.f32.mxu1 %v1495_v0 }
  0x22   : > { %1347 = vmatmul.mubr.msk.f32.gmra.mxu0 %vm330_vm0, %v321_v7  ;;  %1352 = vmatmul.mubr.msk.f32.gmra.mxu1 %vm330_vm0, %v326_v8 }
  0x23   : > { %440 = vmatprep.mubr.f32.mxu0 %v1495_v0  ;;  %470 = vmatprep.mubr.f32.mxu1 %v1495_v0 }
  0x26   : > { %1348 = vmatmul.mubr.msk.f32.gmra.mxu0 %vm330_vm0, %v322_v9  ;;  %1353 = vmatmul.mubr.msk.f32.gmra.mxu1 %vm330_vm0, %v327_v10  ;;  %v313_v10 = vld [vmem:[%s2108_s1 + $0xc] sm:$0x3] }
  0x27   : > { %446 = vmatprep.mubr.f32.mxu0 %v1495_v0  ;;  %771 = vmatprep.mubr.f32.mxu1 %v1495_v0 }
  0x2a   : > { %1349 = vmatmul.mubr.msk.f32.gmra.mxu0 %vm330_vm0, %v323_v11 }
  0x2b   : > { %1024 = vmatprep.mubr.f32.mxu0 %v1495_v0 }
  0xda   : > { %v424_v13 = vpop.f32.mrf.mxu0  ;;  %v454_v14 = vpop.f32.mrf.mxu1 }
  0xdb   : > { %477 = vrot.lane.b32.xlu0 %v424_v13, %s1497_s10 }
  0xdc   : > { %v426_v15 = vpop.f32.mrf.mxu0  ;;  %v456_v16 = vpop.f32.mrf.mxu1 }
  0xdd   : > { %569 = vrot.lane.b32.xlu1 %v456_v16, %s1498_s12  ;;  %v1750_v16 = vrot.slane %v312_v4, %v1683_v39 }
  0xde   : > { %v430_v17 = vpop.f32.mrf.mxu0  ;;  %v460_v19 = vpop.f32.mrf.mxu1 }
  0xdf   : > { %567 = vrot.lane.b32.xlu0 %v454_v14, %s1498_s12  ;;  %v1744_v14 = vrot.slane %v311_v1, %v1683_v39 }
  0xe0   : > { %v432_v18 = vpop.f32.mrf.mxu0  ;;  %v462_v21 = vpop.f32.mrf.mxu1 }
  0xe1   : > { %501 = vrot.lane.b32.xlu1 %v430_v17, %s1499_s13  ;;  %v1753_v17 = vrot.slane %v312_v4, %v1685_v40 }
  0xe2   : > { %v436_v20 = vpop.f32.mrf.mxu0  ;;  %v466_v24 = vpop.f32.mrf.mxu1 }
  0xe3   : > { %479 = vrot.lane.b32.xlu0 %v426_v15, %s1497_s10  ;;  %v1747_v15 = vrot.slane %v311_v1, %v1685_v40 }
  0xe4   : > { %v438_v22 = vpop.f32.mrf.mxu0  ;;  %v468_v26 = vpop.f32.mrf.mxu1 }
  0xe5   : > { %503 = vrot.lane.b32.xlu1 %v432_v18, %s1499_s13 }
  0xe6   : > { %v442_v23 = vpop.f32.mrf.mxu0  ;;  %v472_v27 = vpop.f32.mrf.mxu1 }
  0xe7   : > { %589 = vrot.lane.b32.xlu0 %v460_v19, %s1500_s17 }
  0xe8   : > { %v444_v25 = vpop.f32.mrf.mxu0  ;;  %v474_v28 = vpop.f32.mrf.mxu1 }
  0xe9   : > { %591 = vrot.lane.b32.xlu1 %v462_v21, %s1500_s17  ;;  %v1760_v21 = vrot.slane %v313_v10, %v1685_v40 }
  0xea   : > { %v448_v48 = vpop.f32.mrf.mxu0 }
  0xeb   : > { %523 = vrot.lane.b32.xlu0 %v436_v20, %s1501_s18  ;;  %v1757_v20 = vrot.slane %v313_v10, %v1683_v39 }
  0xec   : > { %v450_v58 = vpop.f32.mrf.mxu0 }
  0xed   : > { %525 = vrot.lane.b32.xlu1 %v438_v22, %s1501_s18 }
  0xef   : > { %611 = vrot.lane.b32.xlu0 %v466_v24, %s2118_s19 }
  0xf1   : > { %547 = vrot.lane.b32.xlu1 %v444_v25, %s1503_s20 }
  0xf3   : > { %545 = vrot.lane.b32.xlu0 %v442_v23, %s1503_s20 }
  0xf5   : > { %613 = vrot.lane.b32.xlu1 %v468_v26, %s2118_s19 }
  0xf7   : > { %633 = vrot.lane.b32.xlu0 %v472_v27, %s2116_s21 }
  0xf9   : > { %635 = vrot.lane.b32.xlu1 %v474_v28, %s2116_s21 }
  0xfb   : > { %657 = vperm.xlu0 %1431, %v316_v29  }
 0x14d   : > { %v478_v30 = vpop.permute.xlu0 %477 }
 0x14f   : > { %v570_v31 = vpop.permute.xlu1 %569 }
 0x151   : > { %v568_v33 = vpop.permute.xlu0 %567 }
 0x152   : > { %v572_v23 = vsel %vm571_vm4, %v568_v33, %v570_v31  ;;  %v573_v24 = vsel %vm571_vm4, %v570_v31, %v568_v33 }
 0x153   : > { %v502_v35 = vpop.permute.xlu1 %501 }
 0x155   : > { %v480_v37 = vpop.permute.xlu0 %479 }
 0x156   : > { %v484_v46 = vsel %vm483_vm1, %v478_v30, %v480_v37  ;;  %v485_v47 = vsel %vm483_vm1, %v480_v37, %v478_v30  ;;  %v586_v37 = vmul.f32 %v1753_v17, %v573_v24  ;;  %v669_v24 = vld [vmem:[%s2110_s3 + $0x18] sm:$0xff] }
 0x157   : > { %v504_v41 = vpop.permute.xlu1 %503  ;;  %v497_v52 = vmul.f32 %v1689_v42, %v485_v47  ;;  %v498_v54 = vmul.f32 %v1695_v44, %v484_v46  ;;  %v1786_v46 = vrot.slane %v314_v32, %v1685_v40 }
 0x158   : > { %v506_v56 = vsel %vm505_vm2, %v502_v35, %v504_v41  ;;  %v507_v57 = vsel %vm505_vm2, %v504_v41, %v502_v35  ;;  %v585_v35 = vmul.f32 %v1750_v16, %v572_v23  ;;  %v668_v23 = vld [vmem:[%s2110_s3 + $0x10] sm:$0xff] }
 0x159   : > { %v590_v45 = vpop.permute.xlu0 %589  ;;  %v499_v5 = vadd.f32 %v497_v52, %v448_v48  ;;  %v519_v6 = vmul.f32 %v1703_v50, %v507_v57  ;;  %v520_v7 = vmul.f32 %v1710_v53, %v506_v56  ;;  %v500_v8 = vadd.f32 %v498_v54, %v450_v58  ;;  %v315_v54 = vld [vmem:[%s2108_s1 + $0x10] sm:$0x3] }
 0x15a   : > { %v1804_v1 = vrot.slane %v315_v54, %v1685_v40 }
 0x15b   : > { %v592_v49 = vpop.permute.xlu1 %591  ;;  %v521_v18 = vadd.f32 %v519_v6, %v499_v5  ;;  %v522_v19 = vadd.f32 %v520_v7, %v500_v8 }
 0x15c   : > { %v594_v31 = vsel %vm593_vm6, %v590_v45, %v592_v49  ;;  %v595_v33 = vsel %vm593_vm6, %v592_v49, %v590_v45 }
 0x15d   : > { %v524_v55 = vpop.permute.xlu0 %523  ;;  %v607_v47 = vmul.f32 %v1757_v20, %v594_v31  ;;  %v608_v48 = vmul.f32 %v1760_v21, %v595_v33 }
 0x15f   : > { %v526_v61 = vpop.permute.xlu1 %525 }
 0x160   : > { %v528_v62 = vsel %vm527_vm3, %v524_v55, %v526_v61  ;;  %v529_v63 = vsel %vm527_vm3, %v526_v61, %v524_v55 }
 0x161   : > { %v612_v9 = vpop.permute.xlu0 %611  ;;  %v541_v11 = vmul.f32 %v1719_v59, %v529_v63  ;;  %v542_v12 = vmul.f32 %v1722_v60, %v528_v62  ;;  %v1801_v63 = vrot.slane %v315_v54, %v1683_v39 }
 0x163   : > { %v548_v13 = vpop.permute.xlu1 %547  ;;  %v543_v27 = vadd.f32 %v541_v11, %v521_v18  ;;  %v544_v28 = vadd.f32 %v542_v12, %v522_v19  ;;  %v666_v19 = vld [vmem:[%s2110_s3] sm:$0xff] }
 0x165   : > { %v546_v22 = vpop.permute.xlu0 %545 }
 0x166   : > { %v550_v25 = vsel %vm549_vm5, %v546_v22, %v548_v13  ;;  %v551_v26 = vsel %vm549_vm5, %v548_v13, %v546_v22  ;;  %v667_v22 = vld [vmem:[%s2110_s3 + $0x8] sm:$0xff] }
 0x167   : > { %v563_v29 = vmul.f32 %v1744_v14, %v551_v26  ;;  %v564_v30 = vmul.f32 %v1747_v15, %v550_v25  ;;  %v614_v34 = vpop.permute.xlu1 %613  ;;  %v670_v25 = vld [vmem:[%s2110_s3 + $0x20] sm:$0xff]  ;;  %v671_v26 = vld [vmem:[%s2110_s3 + $0x28] sm:$0xff] }
 0x168   : > { %v616_v49 = vsel %vm615_vm7, %v612_v9, %v614_v34  ;;  %v617_v52 = vsel %vm615_vm7, %v614_v34, %v612_v9 }
 0x169   : > { %v565_v38 = vadd.f32 %v563_v29, %v543_v27  ;;  %v566_v41 = vadd.f32 %v564_v30, %v544_v28  ;;  %v629_v58 = vmul.f32 %v1783_v43, %v616_v49  ;;  %v630_v61 = vmul.f32 %v1786_v46, %v617_v52  ;;  %v634_v62 = vpop.permute.xlu0 %633  ;;  %v672_v27 = vld [vmem:[%s2110_s3 + $0x30] sm:$0xff]  ;;  %v673_v28 = vld [vmem:[%s2110_s3 + $0x38] sm:$0xff]  ;;  %v674_v29 = vld [vmem:[%s2110_s3 + $0x40] sm:$0xff] }
 0x16b   : > { %v587_v51 = vadd.f32 %v585_v35, %v565_v38  ;;  %v588_v45 = vadd.f32 %v586_v37, %v566_v41  ;;  %v636_v57 = vpop.permute.xlu1 %635 }
 0x16c   : > { %v638_v4 = vsel %vm637_vm8, %v634_v62, %v636_v57  ;;  %v639_v5 = vsel %vm637_vm8, %v636_v57, %v634_v62  ;;  %v317_v57 = vld [vmem:[%s2112_s5 + $0x8] sm:$0xff] }
 0x16d   : > { %v609_v55 = vadd.f32 %v607_v47, %v587_v51  ;;  %v610_v56 = vadd.f32 %v608_v48, %v588_v45  ;;  %v651_v8 = vmul.f32 %v1801_v63, %v638_v4  ;;  %v652_v9 = vmul.f32 %v1804_v1, %v639_v5 }
 0x16f   : > { %v631_v6 = vadd.f32 %v629_v58, %v609_v55  ;;  %v632_v7 = vadd.f32 %v630_v61, %v610_v56 }
 0x171   : > { %v653_v10 = vadd.f32 %v651_v8, %v631_v6  ;;  %v654_v11 = vadd.f32 %v652_v9, %v632_v7 }
 0x176   : > { %v658_v12 = vpop.permute.xlu0 %657 }
 0x177   : > { %v660_v39 = vadd.f32 %v658_v12, %v653_v10  ;;  %v661_v13 = vadd.f32 %v658_v12, %v654_v11 }
 0x179   : > { %v1812_v18 = vmax.f32 %v660_v39, 0.0  ;;  %v1814_v40 = vmax.f32 %v661_v13, 0.0 }
 0x17b   : > { %735 = vmatprep.subr.mxu1 %v1814_v40 }
 0x17c   : > { %736 = vmatpush1.msra.mxu1 %v1812_v18 }
 0x17d   : > { %737 = vmatprep.subr.mxu1 %v1609_v2 }
 0x17e   : > { %738 = vmatpush1.msra.mxu1 %v1611_v3 }
 0x17f   : > { %1354 = vmatmul.mubr.msk.f32.vlgmr.msra.gmra.mxu1 %vm679_vm9, %v666_v19 }
 0x180   : > { %777 = vmatprep.mubr.f32.mxu1 %v1495_v0 }
 0x183   : > { %1355 = vmatmul.mubr.msk.f32.gmra.mxu1 %vm679_vm9, %v667_v22 }
 0x184   : > { %783 = vmatprep.mubr.f32.mxu1 %v1495_v0 }
 0x187   : > { %1356 = vmatmul.mubr.msk.f32.gmra.mxu1 %vm679_vm9, %v668_v23 }
 0x188   : > { %789 = vmatprep.mubr.f32.mxu1 %v1495_v0 }
 0x18b   : > { %1357 = vmatmul.mubr.msk.f32.gmra.mxu1 %vm679_vm9, %v669_v24 }
 0x18c   : > { %795 = vmatprep.mubr.f32.mxu1 %v1495_v0 }
 0x18f   : > { %1358 = vmatmul.mubr.msk.f32.gmra.mxu1 %vm679_vm9, %v670_v25 }
 0x190   : > { %801 = vmatprep.mubr.f32.mxu1 %v1495_v0 }
 0x193   : > { %1359 = vmatmul.mubr.msk.f32.gmra.mxu1 %vm679_vm9, %v671_v26 }
 0x194   : > { %807 = vmatprep.mubr.f32.mxu1 %v1495_v0 }
 0x197   : > { %1360 = vmatmul.mubr.msk.f32.gmra.mxu1 %vm679_vm9, %v672_v27 }
 0x198   : > { %813 = vmatprep.mubr.f32.mxu1 %v1495_v0 }
 0x19b   : > { %1361 = vmatmul.mubr.msk.f32.gmra.mxu1 %vm679_vm9, %v673_v28 }
 0x19c   : > { %819 = vmatprep.mubr.f32.mxu1 %v1495_v0 }
 0x19f   : > { %1362 = vmatmul.mubr.msk.f32.gmra.mxu1 %vm679_vm9, %v674_v29 }
 0x1a0   : > { %1253 = vmatprep.mubr.f32.mxu1 %v1495_v0 }
 0x23f   : > { %v773_v30 = vpop.f32.mrf.mxu1 }
 0x240   : > { %826 = vrot.lane.b32.xlu1 %v773_v30, %s1497_s10 }
 0x241   : > { %v775_v32 = vpop.f32.mrf.mxu1 }
 0x243   : > { %v779_v34 = vpop.f32.mrf.mxu1 }
 0x244   : > { %828 = vrot.lane.b32.xlu1 %v775_v32, %s1497_s10  ;;  %836 = vrot.lane.b32.xlu0 %v779_v34, %s1499_s13 }
 0x245   : > { %v781_v31 = vpop.f32.mrf.mxu1 }
 0x247   : > { %v785_v33 = vpop.f32.mrf.mxu1 }
 0x248   : > { %838 = vrot.lane.b32.xlu1 %v781_v31, %s1499_s13  ;;  %846 = vrot.lane.b32.xlu0 %v785_v33, %s1501_s18 }
 0x249   : > { %v787_v35 = vpop.f32.mrf.mxu1 }
 0x24b   : > { %v791_v37 = vpop.f32.mrf.mxu1 }
 0x24c   : > { %848 = vrot.lane.b32.xlu1 %v787_v35, %s1501_s18  ;;  %856 = vrot.lane.b32.xlu0 %v791_v37, %s1503_s20 }
 0x24d   : > { %v793_v38 = vpop.f32.mrf.mxu1 }
 0x24f   : > { %v797_v41 = vpop.f32.mrf.mxu1 }
 0x250   : > { %858 = vrot.lane.b32.xlu1 %v793_v38, %s1503_s20 }
 0x251   : > { %v799_v47 = vpop.f32.mrf.mxu1 }
 0x253   : > { %v803_v48 = vpop.f32.mrf.mxu1 }
 0x254   : > { %866 = vrot.lane.b32.xlu0 %v803_v48, %s1498_s12 }
 0x255   : > { %v805_v51 = vpop.f32.mrf.mxu1 }
 0x256   : > { %868 = vrot.lane.b32.xlu1 %v805_v51, %s1498_s12 }
 0x257   : > { %v809_v45 = vpop.f32.mrf.mxu1 }
 0x258   : > { %876 = vrot.lane.b32.xlu0 %v809_v45, %s1500_s17 }
 0x259   : > { %v811_v49 = vpop.f32.mrf.mxu1 }
 0x25a   : > { %878 = vrot.lane.b32.xlu1 %v811_v49, %s1500_s17 }
 0x25b   : > { %v815_v52 = vpop.f32.mrf.mxu1 }
 0x25c   : > { %886 = vrot.lane.b32.xlu0 %v815_v52, %s2118_s19 }
 0x25d   : > { %v817_v54 = vpop.f32.mrf.mxu1 }
 0x25e   : > { %888 = vrot.lane.b32.xlu1 %v817_v54, %s2118_s19  ;;  %s296_s19 = sand.u32 1, %s1485_s28  }
 0x25f   : > { %v821_v55 = vpop.f32.mrf.mxu1  ;;  %s1342_s26 = sshll.u32 %s296_s19, 4 }
 0x260   : > { %896 = vrot.lane.b32.xlu0 %v821_v55, %s2122_s23  ;;  %s298_s24 = scalar_lea.vmem [#allocation3], %s1342_s26 }
 0x261   : > { %v823_v56 = vpop.f32.mrf.mxu1  ;;  %s1279_s21 = sshll.u32 %s298_s24, 4  ;;  %s1280_s21 = int_to_ptr.vmem [resolvable:$true] %s1279_s21 }
 0x262   : > { %898 = vrot.lane.b32.xlu1 %v823_v56, %s2122_s23 }
 0x264   : > { %908 = vperm.xlu0 %1431, %v317_v57  }
 0x2b2   : > { %v827_v58 = vpop.permute.xlu1 %826 }
 0x2b6   : > { %v829_v61 = vpop.permute.xlu1 %828  ;;  %v837_v62 = vpop.permute.xlu0 %836 }
 0x2b7   : > { %v830_v11 = vsel %vm483_vm1, %v827_v58, %v829_v61  ;;  %v831_v12 = vsel %vm483_vm1, %v829_v61, %v827_v58 }
 0x2b8   : > { %v832_v22 = vmul.f32 %v831_v12, %v1689_v42  ;;  %v833_v23 = vmul.f32 %v830_v11, %v1695_v44 }
 0x2ba   : > { %v839_v4 = vpop.permute.xlu1 %838  ;;  %v847_v5 = vpop.permute.xlu0 %846  ;;  %v834_v32 = vadd.f32 %v832_v22, %v797_v41  ;;  %v835_v34 = vadd.f32 %v833_v23, %v799_v47 }
 0x2bb   : > { %v840_v13 = vsel %vm505_vm2, %v837_v62, %v839_v4  ;;  %v841_v19 = vsel %vm505_vm2, %v839_v4, %v837_v62 }
 0x2bc   : > { %v842_v27 = vmul.f32 %v841_v19, %v1703_v50  ;;  %v843_v28 = vmul.f32 %v840_v13, %v1710_v53 }
 0x2be   : > { %v849_v6 = vpop.permute.xlu1 %848  ;;  %v857_v7 = vpop.permute.xlu0 %856  ;;  %v844_v51 = vadd.f32 %v842_v27, %v834_v32  ;;  %v845_v45 = vadd.f32 %v843_v28, %v835_v34 }
 0x2bf   : > { %v850_v25 = vsel %vm527_vm3, %v847_v5, %v849_v6  ;;  %v851_v26 = vsel %vm527_vm3, %v849_v6, %v847_v5 }
 0x2c0   : > { %v852_v31 = vmul.f32 %v851_v26, %v1719_v59  ;;  %v853_v33 = vmul.f32 %v850_v25, %v1722_v60 }
 0x2c2   : > { %v859_v8 = vpop.permute.xlu1 %858  ;;  %v854_v54 = vadd.f32 %v852_v31, %v844_v51  ;;  %v855_v55 = vadd.f32 %v853_v33, %v845_v45  ;;  %v917_v33 = vld [vmem:[%s2111_s4] sm:$0xff]  ;;  %v922_v51 = vld [vmem:[%s2111_s4 + $0x28] sm:$0xff]  ;;  %v923_v45 = vld [vmem:[%s2111_s4 + $0x30] sm:$0xff] }
 0x2c3   : > { %v860_v29 = vsel %vm549_vm5, %v857_v7, %v859_v8  ;;  %v861_v30 = vsel %vm549_vm5, %v859_v8, %v857_v7 }
 0x2c4   : > { %v862_v49 = vmul.f32 %v861_v30, %v1744_v14  ;;  %v863_v52 = vmul.f32 %v860_v29, %v1747_v15 }
 0x2c6   : > { %v867_v9 = vpop.permute.xlu0 %866  ;;  %v864_v4 = vadd.f32 %v862_v49, %v854_v54  ;;  %v865_v5 = vadd.f32 %v863_v52, %v855_v55  ;;  %v924_v49 = vld [vmem:[%s2111_s4 + $0x38] sm:$0xff]  ;;  %v925_v52 = vld [vmem:[%s2111_s4 + $0x40] sm:$0xff] }
 0x2c8   : > { %v869_v10 = vpop.permute.xlu1 %868 }
 0x2c9   : > { %v870_v38 = vsel %vm571_vm4, %v867_v9, %v869_v10  ;;  %v871_v48 = vsel %vm571_vm4, %v869_v10, %v867_v9 }
 0x2ca   : > { %v877_v39 = vpop.permute.xlu0 %876  ;;  %v872_v56 = vmul.f32 %v870_v38, %v1750_v16  ;;  %v873_v57 = vmul.f32 %v871_v48, %v1753_v17  ;;  %v920_v38 = vld [vmem:[%s2111_s4 + $0x18] sm:$0xff]  ;;  %v921_v48 = vld [vmem:[%s2111_s4 + $0x20] sm:$0xff] }
 0x2cc   : > { %v879_v24 = vpop.permute.xlu1 %878  ;;  %v874_v11 = vadd.f32 %v872_v56, %v864_v4  ;;  %v875_v12 = vadd.f32 %v873_v57, %v865_v5 }
 0x2cd   : > { %v880_v41 = vsel %vm593_vm6, %v877_v39, %v879_v24  ;;  %v881_v47 = vsel %vm593_vm6, %v879_v24, %v877_v39 }
 0x2ce   : > { %v887_v35 = vpop.permute.xlu0 %886  ;;  %v882_v6 = vmul.f32 %v880_v41, %v1757_v20  ;;  %v883_v7 = vmul.f32 %v881_v47, %v1760_v21 }
 0x2d0   : > { %v889_v37 = vpop.permute.xlu1 %888  ;;  %v884_v19 = vadd.f32 %v882_v6, %v874_v11  ;;  %v885_v22 = vadd.f32 %v883_v7, %v875_v12  ;;  %v318_v12 = vld [vmem:[%s2112_s5 + $0x10] sm:$0xff] }
 0x2d1   : > { %v890_v61 = vsel %vm615_vm7, %v887_v35, %v889_v37  ;;  %v891_v62 = vsel %vm615_vm7, %v889_v37, %v887_v35  ;;  %v918_v35 = vld [vmem:[%s2111_s4 + $0x8] sm:$0xff]  ;;  %v919_v37 = vld [vmem:[%s2111_s4 + $0x10] sm:$0xff] }
 0x2d2   : > { %v897_v8 = vpop.permute.xlu0 %896  ;;  %v892_v39 = vmul.f32 %v890_v61, %v1783_v43  ;;  %v893_v13 = vmul.f32 %v891_v62, %v1786_v46 }
 0x2d4   : > { %v899_v58 = vpop.permute.xlu1 %898  ;;  %v894_v25 = vadd.f32 %v892_v39, %v884_v19  ;;  %v895_v26 = vadd.f32 %v893_v13, %v885_v22  ;;  %v1179_v39 = vld [vmem:[%s2114_s7] sm:$0xff] }
 0x2d5   : > { %v900_v9 = vsel %vm637_vm8, %v897_v8, %v899_v58  ;;  %v901_v10 = vsel %vm637_vm8, %v899_v58, %v897_v8 }
 0x2d6   : > { %v902_v23 = vmul.f32 %v900_v9, %v1801_v63  ;;  %v903_v24 = vmul.f32 %v901_v10, %v1804_v1 }
 0x2d8   : > { %v904_v27 = vadd.f32 %v902_v23, %v894_v25  ;;  %v905_v28 = vadd.f32 %v903_v24, %v895_v26 }
 0x2df   : > { %v909_v29 = vpop.permute.xlu0 %908 }
 0x2e0   : > { %v1932_v30 = vadd.f32 %v909_v29, %v904_v27  ;;  %v1934_v32 = vadd.f32 %v909_v29, %v905_v28 }
 0x2e2   : > { %v913_v34 = vmax.f32 %v1932_v30, 0.0  ;;  %v914_v31 = vmax.f32 %v1934_v32, 0.0 }
 0x2e4   : > { %986 = vmatprep.subr.mxu0 %v914_v31 }
 0x2e5   : > { %987 = vmatpush1.msra.mxu0 %v913_v34 }
 0x2e6   : > { %988 = vmatprep.subr.mxu0 %v1814_v40 }
 0x2e7   : > { %989 = vmatpush1.msra.mxu0 %v1812_v18 }
 0x2e8   : > { %990 = vmatprep.subr.mxu0 %v1609_v2 }
 0x2e9   : > { %991 = vmatpush1.msra.mxu0 %v1611_v3 }
 0x2ea   : > { %1363 = vmatmul.mubr.msk.f32.vlgmr.msra.gmra.mxu0 %vm932_vm10, %v917_v33 }
 0x2eb   : > { %1030 = vmatprep.mubr.f32.mxu0 %v1495_v0 }
 0x2ee   : > { %1364 = vmatmul.mubr.msk.f32.gmra.mxu0 %vm932_vm10, %v918_v35 }
 0x2ef   : > { %1036 = vmatprep.mubr.f32.mxu0 %v1495_v0 }
 0x2f2   : > { %1365 = vmatmul.mubr.msk.f32.gmra.mxu0 %vm932_vm10, %v919_v37 }
 0x2f3   : > { %1042 = vmatprep.mubr.f32.mxu0 %v1495_v0 }
 0x2f6   : > { %1366 = vmatmul.mubr.msk.f32.gmra.mxu0 %vm932_vm10, %v920_v38 }
 0x2f7   : > { %1048 = vmatprep.mubr.f32.mxu0 %v1495_v0 }
 0x2fa   : > { %1367 = vmatmul.mubr.msk.f32.gmra.mxu0 %vm932_vm10, %v921_v48 }
 0x2fb   : > { %1054 = vmatprep.mubr.f32.mxu0 %v1495_v0 }
 0x2fe   : > { %1368 = vmatmul.mubr.msk.f32.gmra.mxu0 %vm932_vm10, %v922_v51 }
 0x2ff   : > { %1060 = vmatprep.mubr.f32.mxu0 %v1495_v0 }
 0x302   : > { %1369 = vmatmul.mubr.msk.f32.gmra.mxu0 %vm932_vm10, %v923_v45 }
 0x303   : > { %1066 = vmatprep.mubr.f32.mxu0 %v1495_v0 }
 0x306   : > { %1370 = vmatmul.mubr.msk.f32.gmra.mxu0 %vm932_vm10, %v924_v49 }
 0x307   : > { %1072 = vmatprep.mubr.f32.mxu0 %v1495_v0 }
 0x30a   : > { %1371 = vmatmul.mubr.msk.f32.gmra.mxu0 %vm932_vm10, %v925_v52 }
 0x3aa   : > { %v1026_v41 = vpop.f32.mrf.mxu0 }
 0x3ab   : > { %1079 = vrot.lane.b32.xlu1 %v1026_v41, %s1497_s10 }
 0x3ac   : > { %v1028_v47 = vpop.f32.mrf.mxu0 }
 0x3ad   : > { %1081 = vrot.lane.b32.xlu0 %v1028_v47, %s1497_s10  ;;  %s2123_s10 = smov 112  }
 0x3ae   : > { %v1032_v54 = vpop.f32.mrf.mxu0 }
 0x3af   : > { %1089 = vrot.lane.b32.xlu1 %v1032_v54, %s1499_s13 }
 0x3b0   : > { %v1034_v55 = vpop.f32.mrf.mxu0 }
 0x3b1   : > { %1091 = vrot.lane.b32.xlu0 %v1034_v55, %s1499_s13  ;;  %s1277_s13 = scalar_lea.hbm %s2115_s8, %s1379_s22 }
 0x3b2   : > { %v1038_v56 = vpop.f32.mrf.mxu0 }
 0x3b3   : > { %1099 = vrot.lane.b32.xlu1 %v1038_v56, %s1501_s18 }
 0x3b4   : > { %v1040_v0 = vpop.f32.mrf.mxu0 }
 0x3b5   : > { %1101 = vrot.lane.b32.xlu0 %v1040_v0, %s1501_s18  ;;  %s1265_s18 = scalar_lea.sflag [#allocation4], %s296_s19 }
 0x3b6   : > { %v1044_v57 = vpop.f32.mrf.mxu0 }
 0x3b7   : > { %1109 = vrot.lane.b32.xlu1 %v1044_v57, %s1503_s20 }
 0x3b8   : > { %v1046_v58 = vpop.f32.mrf.mxu0 }
 0x3b9   : > { %1111 = vrot.lane.b32.xlu0 %v1046_v58, %s1503_s20  ;;  %s1437_s20 = sshll.u32 %s1505_s9, 4  ;;  %s1438_s20 = int_to_ptr.vmem [resolvable:$false] %s1437_s20 }
 0x3ba   : > { %v1050_v61 = vpop.f32.mrf.mxu0  ;;  %p1440_p0 = scmp.lt.s32.totalorder %s1280_s21, %s1438_s20 }
 0x3bc   : > { %v1052_v62 = vpop.f32.mrf.mxu0 }
 0x3be   : > { %v1056_v4 = vpop.f32.mrf.mxu0 }
 0x3bf   : > { %1119 = vrot.lane.b32.xlu1 %v1056_v4, %s1498_s12 }
 0x3c0   : > { %v1058_v5 = vpop.f32.mrf.mxu0 }
 0x3c1   : > { %1121 = vrot.lane.b32.xlu0 %v1058_v5, %s1498_s12  ;;  %s1433_s12 = scalar_lea.vmem %s1280_s21, 256 }
 0x3c2   : > { %v1062_v6 = vpop.f32.mrf.mxu0  ;;  %p1434_p11 = scmp.ne.s32.totalorder %s1280_s21, %s1433_s12 }
 0x3c3   : > { %1129 = vrot.lane.b32.xlu1 %v1062_v6, %s1500_s17 }
 0x3c4   : > { %v1064_v7 = vpop.f32.mrf.mxu0  ;;  %p1435_p12 = pnand %p1434_p11, %p1589_p5 }
 0x3c5   : > { %1131 = vrot.lane.b32.xlu0 %v1064_v7, %s1500_s17  ;;  %s1439_s17 = scalar_lea.vmem %s1438_s20, 512 }
 0x3c6   : > { %v1068_v8 = vpop.f32.mrf.mxu0  ;;  %p1436_p13 = pneg %p1435_p12  ;;  %p1441_p1 = scmp.lt.s32.totalorder %s1439_s17, %s1433_s12 }
 0x3c7   : > { %1139 = vrot.lane.b32.xlu1 %v1068_v8, %s2123_s10 }
 0x3c8   : > { %v1070_v9 = vpop.f32.mrf.mxu0  ;;  %p1442_p2 = por %p1441_p1, %p1440_p0 }
 0x3c9   : > { %1141 = vrot.lane.b32.xlu0 %v1070_v9, %s2123_s10 }
 0x3ca   : > { %v1074_v10 = vpop.f32.mrf.mxu0  ;;  %p1443_p3 = pnand %p1442_p2, %p1436_p13 }
 0x3cb   : > { %1149 = vrot.lane.b32.xlu1 %v1074_v10, %s2122_s23 }
 0x3cc   : > { %v1076_v11 = vpop.f32.mrf.mxu0 }
 0x3cd   : > { %1151 = vrot.lane.b32.xlu0 %v1076_v11, %s2122_s23 }
 0x3cf   : > { %1161 = vperm.xlu1 %1432, %v318_v12  }
 0x3d1   : > { %1182 = vperm.xlu0 %1431, %v1179_v39  }
 0x41d   : > { %v1080_v13 = vpop.permute.xlu1 %1079 }
 0x41f   : > { %v1082_v19 = vpop.permute.xlu0 %1081 }
 0x420   : > { %v1083_v33 = vsel %vm483_vm1, %v1080_v13, %v1082_v19  ;;  %v1084_v35 = vsel %vm483_vm1, %v1082_v19, %v1080_v13 }
 0x421   : > { %v1090_v22 = vpop.permute.xlu1 %1089  ;;  %v1085_v51 = vmul.f32 %v1084_v35, %v1689_v42  ;;  %v1086_v45 = vmul.f32 %v1083_v33, %v1695_v44 }
 0x423   : > { %v1092_v23 = vpop.permute.xlu0 %1091  ;;  %v1087_v42 = vadd.f32 %v1085_v51, %v1050_v61  ;;  %v1088_v0 = vadd.f32 %v1086_v45, %v1052_v62 }
 0x424   : > { %v1093_v38 = vsel %vm505_vm2, %v1090_v22, %v1092_v23  ;;  %v1094_v48 = vsel %vm505_vm2, %v1092_v23, %v1090_v22 }
 0x425   : > { %v1100_v24 = vpop.permute.xlu1 %1099  ;;  %v1095_v47 = vmul.f32 %v1094_v48, %v1703_v50  ;;  %v1096_v54 = vmul.f32 %v1093_v38, %v1710_v53 }
 0x427   : > { %v1102_v25 = vpop.permute.xlu0 %1101  ;;  %v1097_v53 = vadd.f32 %v1095_v47, %v1087_v42  ;;  %v1098_v6 = vadd.f32 %v1096_v54, %v1088_v0 }
 0x428   : > { %v1103_v52 = vsel %vm527_vm3, %v1100_v24, %v1102_v25  ;;  %v1104_v41 = vsel %vm527_vm3, %v1102_v25, %v1100_v24 }
 0x429   : > { %v1110_v26 = vpop.permute.xlu1 %1109  ;;  %v1105_v44 = vmul.f32 %v1104_v41, %v1719_v59  ;;  %v1106_v57 = vmul.f32 %v1103_v52, %v1722_v60 }
 0x42b   : > { %v1112_v27 = vpop.permute.xlu0 %1111  ;;  %v1107_v60 = vadd.f32 %v1105_v44, %v1097_v53  ;;  %v1108_v62 = vadd.f32 %v1106_v57, %v1098_v6 }
 0x42c   : > { %v1113_v55 = vsel %vm549_vm5, %v1110_v26, %v1112_v27  ;;  %v1114_v56 = vsel %vm549_vm5, %v1112_v27, %v1110_v26 }
 0x42d   : > { %v1115_v7 = vmul.f32 %v1114_v56, %v1744_v14  ;;  %v1116_v8 = vmul.f32 %v1113_v55, %v1747_v15 }
 0x42f   : > { %v1117_v15 = vadd.f32 %v1115_v7, %v1107_v60  ;;  %v1118_v39 = vadd.f32 %v1116_v8, %v1108_v62 }
 0x431   : > { %v1120_v28 = vpop.permute.xlu1 %1119 }
 0x433   : > { %v1122_v29 = vpop.permute.xlu0 %1121 }
 0x434   : > { %v1123_v5 = vsel %vm571_vm4, %v1120_v28, %v1122_v29  ;;  %v1124_v50 = vsel %vm571_vm4, %v1122_v29, %v1120_v28 }
 0x435   : > { %v1130_v37 = vpop.permute.xlu1 %1129  ;;  %v1125_v9 = vmul.f32 %v1123_v5, %v1750_v16  ;;  %v1126_v10 = vmul.f32 %v1124_v50, %v1753_v17 }
 0x437   : > { %v1132_v49 = vpop.permute.xlu0 %1131  ;;  %v1127_v17 = vadd.f32 %v1125_v9, %v1117_v15  ;;  %v1128_v24 = vadd.f32 %v1126_v10, %v1118_v39 }
 0x438   : > { %v1133_v61 = vsel %vm593_vm6, %v1130_v37, %v1132_v49  ;;  %v1134_v59 = vsel %vm593_vm6, %v1132_v49, %v1130_v37 }
 0x439   : > { %v1140_v58 = vpop.permute.xlu1 %1139  ;;  %v1135_v13 = vmul.f32 %v1133_v61, %v1757_v20  ;;  %v1136_v19 = vmul.f32 %v1134_v59, %v1760_v21 }
 0x43b   : > { %v1142_v4 = vpop.permute.xlu0 %1141  ;;  %v1137_v27 = vadd.f32 %v1135_v13, %v1127_v17  ;;  %v1138_v28 = vadd.f32 %v1136_v19, %v1128_v24 }
 0x43c   : > { %v1143_v12 = vsel %vm615_vm7, %v1140_v58, %v1142_v4  ;;  %v1144_v14 = vsel %vm615_vm7, %v1142_v4, %v1140_v58 }
 0x43d   : > { %v1150_v22 = vpop.permute.xlu1 %1149  ;;  %v1145_v25 = vmul.f32 %v1143_v12, %v1783_v43  ;;  %v1146_v26 = vmul.f32 %v1144_v14, %v1786_v46  ;;  %v1170_v43 = vld [vmem:[%s2113_s6] sm:$0xff] }
 0x43f   : > { %v1152_v11 = vpop.permute.xlu0 %1151  ;;  %v1147_v21 = vadd.f32 %v1145_v25, %v1137_v27  ;;  %v1148_v33 = vadd.f32 %v1146_v26, %v1138_v28 }
 0x440   : > { %v1153_v23 = vsel %vm637_vm8, %v1150_v22, %v1152_v11  ;;  %v1154_v16 = vsel %vm637_vm8, %v1152_v11, %v1150_v22 }
 0x441   : > { %v1155_v29 = vmul.f32 %v1153_v23, %v1801_v63  ;;  %v1156_v20 = vmul.f32 %v1154_v16, %v1804_v1 }
 0x443   : > { %v1157_v35 = vadd.f32 %v1155_v29, %v1147_v21  ;;  %v1158_v37 = vadd.f32 %v1156_v20, %v1148_v33 }
 0x44a   : > { %v1162_v38 = vpop.permute.xlu1 %1161 }
 0x44b   : > { %v1164_v36 = vadd.f32 %v1162_v38, %v1157_v35  ;;  %v1165_v48 = vadd.f32 %v1162_v38, %v1158_v37 }
 0x44c   : > { %v1183_v46 = vpop.permute.xlu0 %1182 }
 0x44d   : > { %v1166_v51 = vmax.f32 %v1164_v36, 0.0  ;;  %v1167_v45 = vmax.f32 %v1165_v48, 0.0 }
 0x44f   : > { %1213 = vmatprep.subr.mxu1 %v1167_v45 }
 0x450   : > { %1214 = vmatpush1.msra.mxu1 %v1166_v51 }
 0x451   : > { %1215 = vmatprep.subr.mxu1 %v914_v31 }
 0x452   : > { %1216 = vmatpush1.msra.mxu1 %v913_v34 }
 0x453   : > { %1217 = vmatprep.subr.mxu1 %v1814_v40 }
 0x454   : > { %1218 = vmatpush1.msra.mxu1 %v1812_v18 }
 0x455   : > { %1219 = vmatprep.subr.mxu1 %v1609_v2 }
 0x456   : > { %1220 = vmatpush1.msra.mxu1 %v1611_v3 }
 0x457   : > { %1372 = vmatmul.mubr.msk.f32.vlgmr.msra.gmra.mxu1 %vm1185_vm11, %v1170_v43 }
 0x517   : > { %v1255_v63 = vpop.f32.mrf.mxu1 }
 0x518   : > { %v1256_v1 = vadd.f32 %v1255_v63, %v1183_v46 }
 0x519   : > { %v1257_v30 = vpop.f32.mrf.mxu1 }
 0x51a   : > { %v1260_v18 = vadd.f32 %v1256_v1, %v1611_v3  ;;  %v1258_v40 = vadd.f32 %v1257_v30, %v1183_v46 }
 0x51c   : > { %1262 = vst [vmem:[%s298_s24] sm:$0xff] %v1260_v18  ;;  %v1261_v32 = vadd.f32 %v1258_v40, %v1609_v2 }
 0x51e   : > { %1263 = vst [vmem:[%s298_s24 + $0x8] sm:$0xff] %v1261_v32 }
 0x51f   : > { %1446 = shalt.err (!%p1443_p3)
}
 0x520   : > { %s1447_s23 = scalar_lea.hbm %s1277_s13, 256  ;;  %s1451_s22 = scalar_lea.hbm %s2115_s8, 512 }
 0x521   : > { %p1448_p4 = scmp.ne.s32.totalorder %s1277_s13, %s1447_s23  ;;  %p1452_p9 = scmp.lt.s32.totalorder %s1277_s13, %s2115_s8 }
 0x522   : > { %p1453_p10 = scmp.lt.s32.totalorder %s1451_s22, %s1447_s23 }
 0x523   : > { %p1449_p7 = pnand %p1448_p4, %p1589_p5 }
 0x524   : > { %p1454_p11 = por %p1453_p10, %p1452_p9 }
 0x525   : > { %p1450_p8 = pneg %p1449_p7 }
 0x527   : > { %p1455_p12 = pnand %p1454_p11, %p1450_p8 }
 0x529   : > { %1458 = shalt.err (!%p1455_p12)
}
 0x52a   : > { %1382 = dma.vmem_to_hbm [thread:$0]  (%p1589_p5), %s1280_s21, 256, %s1277_s13, %s1265_s18  }
 0x52b PF: > { %p1388_p13 = scmp.ge.s32.totalorder %s1493_s30, 2  ;;  %s1291_s10 = sand.u32 1, %s1481_s27  }
 0x52c   : > { %s1292_s12 = scalar_lea.sflag [#allocation4], %s1291_s10 }
 0x52d   : > { %p1385_p0 = pnand %p1388_p13, %p1593_p6 }
 0x52f   : > { %p1386_p1 = pneg %p1385_p0 }
 0x531   : > { %1476 = dma.done.wait (%p1386_p1), %s1292_s12, 256  }
 0x532   : > { %1478 = vsyncadd (%p1386_p1), %s1292_s12, 4294967040  ;;  %p18_p2 = scmp.ge.s32.totalorder %s1576_s11, 4   ;;  %s2124_s27 = smov %s1485_s28 }
 0x533   : > { %s2125_s28 = smov %s1489_s29  ;;  %s2126_s29 = smov %s1587_s14 }
 0x534   : > { %s2127_s30 = smov %s1576_s11  ;;  %20 = sbr.rel (!%p18_p2) target bundleno = 3 (0x3), region = 87 }
 0x539   :  { %1297 = vsyncpa [#allocation4], 1 }
 0x53a   :  { %1299 = vsyncpa [#allocation4 + $0x1], 1 }

</bundles_post_ra>
